<compile_context>
chip_gen: v6e
topology: v6e:2x2x1
jax: 0.10.0
libtpu: 0.0.40
codegen_flags: <defaults>
</compile_context>

<pallas_src>
import functools

import jax
import jax.numpy as jnp
from jax.experimental import pallas as pl
from jax.experimental.pallas import tpu as pltpu

EPS = 1e-5


# ---------------------------------------------------------------------------
# Kernels
# ---------------------------------------------------------------------------
def _conv_stage_kernel(*refs, apply_bn, H, W, cin, cout, mxu_dtype):
    """One image: [optional BN+ReLU] -> row zero-halo (in registers) -> 3x3 conv.

    The conv is 3 lane-dense MXU matmuls (one per kernel row dy):
        acc[H, W*cout] += a_pad[dy:dy+H, :] @ w_ref[dy]        # K = W*cin
    Column (dx) padding is folded into the block-banded weight, so no lane
    padding and no im2col relayout is needed.  Also emits per-image partial
    BN statistics (sum, sum of squares) in f32 (single pass over acc).
    """
    if apply_bn:
        a_ref, scale_ref, shift_ref, w_ref, z_ref, stat_ref = refs
    else:
        a_ref, w_ref, z_ref, stat_ref = refs

    a = a_ref[...].astype(jnp.float32)                        # [H, W*cin]
    if apply_bn:
        # BN affine (scale/shift precomputed from global stats) + ReLU, in f32.
        a = jnp.maximum(a * scale_ref[...] + shift_ref[...], 0.0)

    # 1-row zero halo only (top/bottom), built in registers -- no scratch, no
    # full-slab zeroing; left/right halo is implicit in the banded weight.
    zrow = jnp.zeros((1, W * cin), jnp.float32)
    a_pad = jnp.concatenate([zrow, a, zrow], axis=0)           # [H+2, W*cin]
    a_pad = a_pad.astype(mxu_dtype)                            # bf16 for the MXU

    acc = jnp.zeros((H, W * cout), jnp.float32)
    for dy in range(3):                                        # static unroll: 3 deep dots
        acc = acc + jnp.dot(a_pad[dy:dy + H, :], w_ref[dy],
                            preferred_element_type=jnp.float32)

    z_ref[...] = acc                                           # lane-dense store [H, W*cout]
    ssum = jnp.sum(acc, axis=0, keepdims=True)                 # [1, W*cout]
    ssq = jnp.sum(acc * acc, axis=0, keepdims=True)            # [1, W*cout]
    stat_ref[...] = jnp.concatenate([ssum, ssq], axis=0)       # [2, W*cout]


def _bn_relu_kernel(z_ref, scale_ref, shift_ref, o_ref):
    """Final BN affine + ReLU, lane-dense elementwise."""
    o_ref[...] = jnp.maximum(z_ref[...] * scale_ref[...] + shift_ref[...], 0.0)


# ---------------------------------------------------------------------------
# Wrapper helpers (plain-JAX glue)
# ---------------------------------------------------------------------------
def _banded_weight(w_oihw, W):
    """PyTorch OIHW 3x3 weight -> [3, W*cin, W*cout] block-banded matrices.

    band[dy, xin*cin + ci, ox*cout + co] = w[co, ci, dy, xin - ox + 1]
                                           if |xin - ox| <= 1 else 0.
    Folding the dx taps (and implicit left/right zero padding) into the weight
    lets the kernel do a whole conv row as one full-width matmul per dy.
    """
    wk = jnp.transpose(w_oihw, (2, 3, 1, 0))                   # [dy, dx, cin, cout]
    cin, cout = wk.shape[2], wk.shape[3]
    xin = jnp.arange(W)[:, None]
    ox = jnp.arange(W)[None, :]
    dx = xin - ox + 1                                          # [W, W]
    valid = (dx >= 0) & (dx <= 2)
    band = wk[:, jnp.clip(dx, 0, 2)]                           # [3, W, W, cin, cout]
    band = jnp.where(valid[None, :, :, None, None], band, 0.0)
    band = jnp.transpose(band, (0, 1, 3, 2, 4))                # [3, W, cin, W, cout]
    return band.reshape(3, W * cin, W * cout)


def _bn_scale_shift(stats, gamma, beta, count, W, C):
    """Global BN (training mode) scale/shift from per-image partial sums.

    stats: [N, 2, W*C] f32 partial (sum, sum-of-squares).  Returns [1, W*C]
    rows (per-channel values tiled across W) ready for the lane-merged layout.
    """
    s = jnp.sum(stats.astype(jnp.float32), axis=0)             # [2, W*C]
    s = s.reshape(2, W, C).sum(axis=1)                         # [2, C]
    mean = s[0] / count
    var = s[1] / count - mean * mean                           # biased var, f32
    inv = jax.lax.rsqrt(var + EPS)
    scale = gamma.astype(jnp.float32) * inv
    shift = beta.astype(jnp.float32) - mean * scale
    return jnp.tile(scale, W)[None, :], jnp.tile(shift, W)[None, :]


def _compiler_params():
    return pltpu.CompilerParams(
        dimension_semantics=("parallel",),        # shard batch across TCs (v7x)
        vmem_limit_bytes=32 * 1024 * 1024)


def _conv_stage(a, w_band, scale_row, shift_row, *, N, H, W, cin, cout, mxu_dtype):
    """pallas_call for one (optional BN+ReLU) -> conv3x3 stage, grid over N."""
    apply_bn = scale_row is not None
    kernel = functools.partial(
        _conv_stage_kernel, apply_bn=apply_bn,
        H=H, W=W, cin=cin, cout=cout, mxu_dtype=mxu_dtype)

    in_specs = [pl.BlockSpec((None, H, W * cin), lambda n: (n, 0, 0))]
    args = [a]
    if apply_bn:
        in_specs.append(pl.BlockSpec((1, W * cin), lambda n: (0, 0)))
        in_specs.append(pl.BlockSpec((1, W * cin), lambda n: (0, 0)))
        args += [scale_row, shift_row]
    in_specs.append(pl.BlockSpec((3, W * cin, W * cout), lambda n: (0, 0, 0)))
    args.append(w_band)

    z, stats = pl.pallas_call(
        kernel,
        grid=(N,),
        in_specs=in_specs,
        out_specs=(pl.BlockSpec((None, H, W * cout), lambda n: (n, 0, 0)),
                   pl.BlockSpec((None, 2, W * cout), lambda n: (n, 0, 0))),
        out_shape=(jax.ShapeDtypeStruct((N, H, W * cout), jnp.float32),
                   jax.ShapeDtypeStruct((N, 2, W * cout), jnp.float32)),
        compiler_params=_compiler_params(),
    )(*args)
    return z, stats


def _bn_relu(z, scale_row, shift_row, *, N, H, W, C):
    return pl.pallas_call(
        _bn_relu_kernel,
        grid=(N,),
        in_specs=[pl.BlockSpec((None, H, W * C), lambda n: (n, 0, 0)),
                  pl.BlockSpec((1, W * C), lambda n: (0, 0)),
                  pl.BlockSpec((1, W * C), lambda n: (0, 0))],
        out_specs=pl.BlockSpec((None, H, W * C), lambda n: (n, 0, 0)),
        out_shape=jax.ShapeDtypeStruct((N, H, W * C), jnp.float32),
        compiler_params=_compiler_params(),
    )(z, scale_row, shift_row)


# ---------------------------------------------------------------------------
# Public entry point (NCHW in / NCHW out, matches the PyTorch module)
# ---------------------------------------------------------------------------
@functools.partial(jax.jit, static_argnames=("mxu_dtype",))
def double_conv(x_nchw, w1, b1, g1, bt1, w2, b2, g2, bt2,
                mxu_dtype=jnp.bfloat16):
    """DoubleConv forward (BatchNorm in training-mode / batch-stats semantics).

    b1/b2 are accepted for API parity but unused: a conv bias followed by
    BatchNorm is exactly cancelled by the mean subtraction.
    """
    del b1, b2
    N, Cin, H, W = x_nchw.shape
    Cout = w1.shape[0]
    count = N * H * W

    # NCHW -> lane-merged NHWC slab [N, H, W*Cin] (single layout copy; no jnp.pad:
    # the halo is added in-registers inside the kernel).
    x_m = jnp.transpose(x_nchw, (0, 2, 3, 1)).reshape(N, H, W * Cin)
    x_m = x_m.astype(jnp.float32)

    # Block-banded conv weights (built once; cast for the MXU).
    wb1 = _banded_weight(w1, W).astype(mxu_dtype)              # [3, W*Cin,  W*Cout]
    wb2 = _banded_weight(w2, W).astype(mxu_dtype)              # [3, W*Cout, W*Cout]

    # Stage 1: conv1 + partial BN1 stats.
    z1, s1 = _conv_stage(x_m, wb1, None, None,
                         N=N, H=H, W=W, cin=Cin, cout=Cout, mxu_dtype=mxu_dtype)
    sc1, sh1 = _bn_scale_shift(s1, g1, bt1, count, W, Cout)

    # Stage 2: BN1 + ReLU fused with conv2 + partial BN2 stats.
    z2, s2 = _conv_stage(z1, wb2, sc1, sh1,
                         N=N, H=H, W=W, cin=Cout, cout=Cout, mxu_dtype=mxu_dtype)
    sc2, sh2 = _bn_scale_shift(s2, g2, bt2, count, W, Cout)

    # Stage 3: BN2 + ReLU (lane-dense elementwise kernel).
    out_m = _bn_relu(z2, sc2, sh2, N=N, H=H, W=W, C=Cout)

    return out_m.reshape(N, H, W, Cout).transpose(0, 3, 1, 2)


# ---------------------------------------------------------------------------
# Pure-JAX reference (keeps the conv bias; training-mode BN)
# ---------------------------------------------------------------------------
def _ref_double_conv(x, w1, b1, g1, bt1, w2, b2, g2, bt2):
    def conv_bn_relu(x, w, b, g, bt):
        y = jax.lax.conv_general_dilated(
            x, w, window_strides=(1, 1), padding=((1, 1), (1, 1)),
            dimension_numbers=("NCHW", "OIHW", "NCHW"))
        y = y + b[None, :, None, None]
        mean = jnp.mean(y, axis=(0, 2, 3), keepdims=True)
        var = jnp.mean((y - mean) ** 2, axis=(0, 2, 3), keepdims=True)
        y = (y - mean) / jnp.sqrt(var + EPS)
        y = y * g[None, :, None, None] + bt[None, :, None, None]
        return jnp.maximum(y, 0.0)

    return conv_bn_relu(conv_bn_relu(x, w1, b1, g1, bt1), w2, b2, g2, bt2)


if __name__ == "__main__":
    N, Cin, Cout, H, W = 2, 4, 8, 16, 16
    keys = jax.random.split(jax.random.PRNGKey(0), 10)

    x = jax.random.normal(keys[0], (N, Cin, H, W), jnp.float32)

    bound1 = 1.0 / jnp.sqrt(Cin * 9.0)
    w1 = jax.random.uniform(keys[1], (Cout, Cin, 3, 3), jnp.float32, -bound1, bound1)
    b1 = jax.random.uniform(keys[2], (Cout,), jnp.float32, -bound1, bound1)
    g1 = 1.0 + 0.1 * jax.random.normal(keys[3], (Cout,), jnp.float32)
    bt1 = 0.1 * jax.random.normal(keys[4], (Cout,), jnp.float32)

    bound2 = 1.0 / jnp.sqrt(Cout * 9.0)
    w2 = jax.random.uniform(keys[5], (Cout, Cout, 3, 3), jnp.float32, -bound2, bound2)
    b2 = jax.random.uniform(keys[6], (Cout,), jnp.float32, -bound2, bound2)
    g2 = 1.0 + 0.1 * jax.random.normal(keys[7], (Cout,), jnp.float32)
    bt2 = 0.1 * jax.random.normal(keys[8], (Cout,), jnp.float32)

    ref = _ref_double_conv(x, w1, b1, g1, bt1, w2, b2, g2, bt2)

    # f32 MXU path: tight check (also proves the bias-drop is exact under BN,
    # since the reference keeps the bias).
    out_f32 = jax.block_until_ready(
        double_conv(x, w1, b1, g1, bt1, w2, b2, g2, bt2, mxu_dtype=jnp.float32))
    assert out_f32.shape == (N, Cout, H, W)
    assert jnp.allclose(out_f32, ref, atol=2e-4, rtol=2e-4), \
        f"f32 max abs err {jnp.max(jnp.abs(out_f32 - ref))}"

    # Default bf16 MXU path (dots in bf16, BN/stats in f32): loose check vs f32 ref.
    out_bf16 = jax.block_until_ready(
        double_conv(x, w1, b1, g1, bt1, w2, b2, g2, bt2))
    assert out_bf16.shape == (N, Cout, H, W)
    assert jnp.allclose(out_bf16, ref, atol=7.5e-2, rtol=7.5e-2), \
        f"bf16 max abs err {jnp.max(jnp.abs(out_bf16 - ref))}"

    print("KERNEL_OK")
</pallas_src>

<mosaic_0001>
module attributes {stable_mosaic.version = 11 : i64} {
  func.func @_conv_stage_kernel(%arg0: i32, %arg1: memref<1x16x64xf32, #tpu.memory_space<vmem>>, %arg2: memref<3x64x128xf32, #tpu.memory_space<vmem>>, %arg3: memref<1x16x128xf32, #tpu.memory_space<vmem>>, %arg4: memref<1x2x128xf32, #tpu.memory_space<vmem>>) attributes {dimension_semantics = [#tpu.dimension_semantics<parallel>], iteration_bounds = array<i64: 2>, scalar_prefetch = 0 : i64, scratch_operands = 0 : i64, tpu.core_type = #tpu.core_type<tc>, window_params = [{transform_indices = @transform_0, window_bounds = array<i64: 1, 16, 64>}, {pipeline_mode = #tpu.pipeline_mode<synchronous>, transform_indices = @transform_1, window_bounds = array<i64: 3, 64, 128>}, {transform_indices = @transform_2, window_bounds = array<i64: 1, 16, 128>}, {transform_indices = @transform_3, window_bounds = array<i64: 1, 2, 128>}]} {
    %c0 = arith.constant 0 : index
    %c0_0 = arith.constant 0 : index
    %c0_1 = arith.constant 0 : index
    %0 = vector.load %arg1[%c0, %c0_0, %c0_1] : memref<1x16x64xf32, #tpu.memory_space<vmem>>, vector<1x16x64xf32>
    %1 = vector.shape_cast %0 : vector<1x16x64xf32> to vector<16x64xf32>
    %cst = arith.constant 0.000000e+00 : f32
    %2 = vector.broadcast %cst : f32 to vector<1x64xf32>
    %3 = tpu.concatenate %2, %1, %2 in 0 : vector<1x64xf32>, vector<16x64xf32>, vector<1x64xf32> -> vector<18x64xf32>
    %cst_2 = arith.constant 0.000000e+00 : f32
    %4 = vector.broadcast %cst_2 : f32 to vector<16x128xf32>
    %5 = vector.extract_strided_slice %3 {offsets = [0, 0], sizes = [16, 64], strides = [1, 1]} : vector<18x64xf32> to vector<16x64xf32>
    %c0_3 = arith.constant 0 : index
    %c0_4 = arith.constant 0 : index
    %c0_5 = arith.constant 0 : index
    %6 = vector.load %arg2[%c0_3, %c0_4, %c0_5] : memref<3x64x128xf32, #tpu.memory_space<vmem>>, vector<1x64x128xf32>
    %7 = vector.shape_cast %6 : vector<1x64x128xf32> to vector<64x128xf32>
    %cst_6 = arith.constant dense<0.000000e+00> : vector<16x128xf32>
    %8 = tpu.matmul %5, %7, %cst_6 {dimension_numbers = #tpu.dot_dimension_numbers<[1], [0], [0], [1], [0, 0, 1, 1], [], []>} : vector<16x64xf32>, vector<64x128xf32>, vector<16x128xf32> -> vector<16x128xf32>
    %9 = arith.addf %4, %8 : vector<16x128xf32>
    %10 = vector.extract_strided_slice %3 {offsets = [1, 0], sizes = [16, 64], strides = [1, 1]} : vector<18x64xf32> to vector<16x64xf32>
    %c1 = arith.constant 1 : index
    %c0_7 = arith.constant 0 : index
    %c0_8 = arith.constant 0 : index
    %11 = vector.load %arg2[%c1, %c0_7, %c0_8] : memref<3x64x128xf32, #tpu.memory_space<vmem>>, vector<1x64x128xf32>
    %12 = vector.shape_cast %11 : vector<1x64x128xf32> to vector<64x128xf32>
    %cst_9 = arith.constant dense<0.000000e+00> : vector<16x128xf32>
    %13 = tpu.matmul %10, %12, %cst_9 {dimension_numbers = #tpu.dot_dimension_numbers<[1], [0], [0], [1], [0, 0, 1, 1], [], []>} : vector<16x64xf32>, vector<64x128xf32>, vector<16x128xf32> -> vector<16x128xf32>
    %14 = arith.addf %9, %13 : vector<16x128xf32>
    %15 = vector.extract_strided_slice %3 {offsets = [2, 0], sizes = [16, 64], strides = [1, 1]} : vector<18x64xf32> to vector<16x64xf32>
    %c2 = arith.constant 2 : index
    %c0_10 = arith.constant 0 : index
    %c0_11 = arith.constant 0 : index
    %16 = vector.load %arg2[%c2, %c0_10, %c0_11] : memref<3x64x128xf32, #tpu.memory_space<vmem>>, vector<1x64x128xf32>
    %17 = vector.shape_cast %16 : vector<1x64x128xf32> to vector<64x128xf32>
    %cst_12 = arith.constant dense<0.000000e+00> : vector<16x128xf32>
    %18 = tpu.matmul %15, %17, %cst_12 {dimension_numbers = #tpu.dot_dimension_numbers<[1], [0], [0], [1], [0, 0, 1, 1], [], []>} : vector<16x64xf32>, vector<64x128xf32>, vector<16x128xf32> -> vector<16x128xf32>
    %19 = arith.addf %14, %18 : vector<16x128xf32>
    %c0_13 = arith.constant 0 : index
    %c0_14 = arith.constant 0 : index
    %c0_15 = arith.constant 0 : index
    %20 = vector.load %arg3[%c0_13, %c0_14, %c0_15] : memref<1x16x128xf32, #tpu.memory_space<vmem>>, vector<1x16x128xf32>
    %21 = vector.shape_cast %20 : vector<1x16x128xf32> to vector<16x128xf32>
    %22 = vector.shape_cast %19 : vector<16x128xf32> to vector<1x16x128xf32>
    tpu.vector_store %arg3[%c0_13, %c0_14, %c0_15], %22 {strides = array<i32>} : memref<1x16x128xf32, #tpu.memory_space<vmem>>, vector<1x16x128xf32>,
    %cst_16 = arith.constant dense<0.000000e+00> : vector<128xf32>
    %23 = vector.multi_reduction <add>, %19, %cst_16 [0] : vector<16x128xf32> to vector<128xf32>
    %24 = vector.shape_cast %23 : vector<128xf32> to vector<1x128xf32>
    %25 = arith.mulf %19, %19 : vector<16x128xf32>
    %cst_17 = arith.constant dense<0.000000e+00> : vector<128xf32>
    %26 = vector.multi_reduction <add>, %25, %cst_17 [0] : vector<16x128xf32> to vector<128xf32>
    %27 = vector.shape_cast %26 : vector<128xf32> to vector<1x128xf32>
    %28 = tpu.concatenate %24, %27 in 0 : vector<1x128xf32>, vector<1x128xf32> -> vector<2x128xf32>
    %c0_18 = arith.constant 0 : index
    %c0_19 = arith.constant 0 : index
    %c0_20 = arith.constant 0 : index
    %29 = vector.load %arg4[%c0_18, %c0_19, %c0_20] : memref<1x2x128xf32, #tpu.memory_space<vmem>>, vector<1x2x128xf32>
    %30 = vector.shape_cast %29 : vector<1x2x128xf32> to vector<2x128xf32>
    %31 = vector.shape_cast %28 : vector<2x128xf32> to vector<1x2x128xf32>
    tpu.vector_store %arg4[%c0_18, %c0_19, %c0_20], %31 {strides = array<i32>} : memref<1x2x128xf32, #tpu.memory_space<vmem>>, vector<1x2x128xf32>,
    return
  }
  func.func @transform_0(%arg0: i32) -> (i32, i32, i32) {
    %c0_i32 = arith.constant 0 : i32
    %c0_i32_0 = arith.constant 0 : i32
    %c0_i32_1 = arith.constant 0 : i32
    return %arg0, %c0_i32, %c0_i32_0 : i32, i32, i32
  }
  func.func @transform_1(%arg0: i32) -> (i32, i32, i32) {
    %c0_i32 = arith.constant 0 : i32
    %c0_i32_0 = arith.constant 0 : i32
    %c0_i32_1 = arith.constant 0 : i32
    %c0_i32_2 = arith.constant 0 : i32
    return %c0_i32, %c0_i32_0, %c0_i32_1 : i32, i32, i32
  }
  func.func @transform_2(%arg0: i32) -> (i32, i32, i32) {
    %c0_i32 = arith.constant 0 : i32
    %c0_i32_0 = arith.constant 0 : i32
    %c0_i32_1 = arith.constant 0 : i32
    return %arg0, %c0_i32, %c0_i32_0 : i32, i32, i32
  }
  func.func @transform_3(%arg0: i32) -> (i32, i32, i32) {
    %c0_i32 = arith.constant 0 : i32
    %c0_i32_0 = arith.constant 0 : i32
    %c0_i32_1 = arith.constant 0 : i32
    return %arg0, %c0_i32, %c0_i32_0 : i32, i32, i32
  }
}

module attributes {stable_mosaic.version = 11 : i64} {
  func.func @_conv_stage_kernel(%arg0: i32, %arg1: memref<1x16x128xf32, #tpu.memory_space<vmem>>, %arg2: memref<1x128xf32, #tpu.memory_space<vmem>>, %arg3: memref<1x128xf32, #tpu.memory_space<vmem>>, %arg4: memref<3x128x128xf32, #tpu.memory_space<vmem>>, %arg5: memref<1x16x128xf32, #tpu.memory_space<vmem>>, %arg6: memref<1x2x128xf32, #tpu.memory_space<vmem>>) attributes {dimension_semantics = [#tpu.dimension_semantics<parallel>], iteration_bounds = array<i64: 2>, scalar_prefetch = 0 : i64, scratch_operands = 0 : i64, tpu.core_type = #tpu.core_type<tc>, window_params = [{transform_indices = @transform_0, window_bounds = array<i64: 1, 16, 128>}, {pipeline_mode = #tpu.pipeline_mode<synchronous>, transform_indices = @transform_1, window_bounds = array<i64: 1, 128>}, {pipeline_mode = #tpu.pipeline_mode<synchronous>, transform_indices = @transform_2, window_bounds = array<i64: 1, 128>}, {pipeline_mode = #tpu.pipeline_mode<synchronous>, transform_indices = @transform_3, window_bounds = array<i64: 3, 128, 128>}, {transform_indices = @transform_4, window_bounds = array<i64: 1, 16, 128>}, {transform_indices = @transform_5, window_bounds = array<i64: 1, 2, 128>}]} {
    %c0 = arith.constant 0 : index
    %c0_0 = arith.constant 0 : index
    %c0_1 = arith.constant 0 : index
    %0 = vector.load %arg1[%c0, %c0_0, %c0_1] : memref<1x16x128xf32, #tpu.memory_space<vmem>>, vector<1x16x128xf32>
    %1 = vector.shape_cast %0 : vector<1x16x128xf32> to vector<16x128xf32>
    %c0_2 = arith.constant 0 : index
    %c0_3 = arith.constant 0 : index
    %2 = vector.load %arg2[%c0_2, %c0_3] : memref<1x128xf32, #tpu.memory_space<vmem>>, vector<1x128xf32>
    %3 = vector.broadcast %2 : vector<1x128xf32> to vector<16x128xf32>
    %4 = arith.mulf %1, %3 : vector<16x128xf32>
    %c0_4 = arith.constant 0 : index
    %c0_5 = arith.constant 0 : index
    %5 = vector.load %arg3[%c0_4, %c0_5] : memref<1x128xf32, #tpu.memory_space<vmem>>, vector<1x128xf32>
    %6 = vector.broadcast %5 : vector<1x128xf32> to vector<16x128xf32>
    %7 = arith.addf %4, %6 : vector<16x128xf32>
    %cst = arith.constant 0.000000e+00 : f32
    %8 = vector.broadcast %cst : f32 to vector<16x128xf32>
    %9 = arith.maximumf %7, %8 : vector<16x128xf32>
    %cst_6 = arith.constant 0.000000e+00 : f32
    %10 = vector.broadcast %cst_6 : f32 to vector<1x128xf32>
    %11 = tpu.concatenate %10, %9, %10 in 0 : vector<1x128xf32>, vector<16x128xf32>, vector<1x128xf32> -> vector<18x128xf32>
    %cst_7 = arith.constant 0.000000e+00 : f32
    %12 = vector.broadcast %cst_7 : f32 to vector<16x128xf32>
    %13 = vector.extract_strided_slice %11 {offsets = [0, 0], sizes = [16, 128], strides = [1, 1]} : vector<18x128xf32> to vector<16x128xf32>
    %c0_8 = arith.constant 0 : index
    %c0_9 = arith.constant 0 : index
    %c0_10 = arith.constant 0 : index
    %14 = vector.load %arg4[%c0_8, %c0_9, %c0_10] : memref<3x128x128xf32, #tpu.memory_space<vmem>>, vector<1x128x128xf32>
    %15 = vector.shape_cast %14 : vector<1x128x128xf32> to vector<128x128xf32>
    %cst_11 = arith.constant dense<0.000000e+00> : vector<16x128xf32>
    %16 = tpu.matmul %13, %15, %cst_11 {dimension_numbers = #tpu.dot_dimension_numbers<[1], [0], [0], [1], [0, 0, 1, 1], [], []>} : vector<16x128xf32>, vector<128x128xf32>, vector<16x128xf32> -> vector<16x128xf32>
    %17 = arith.addf %12, %16 : vector<16x128xf32>
    %18 = vector.extract_strided_slice %11 {offsets = [1, 0], sizes = [16, 128], strides = [1, 1]} : vector<18x128xf32> to vector<16x128xf32>
    %c1 = arith.constant 1 : index
    %c0_12 = arith.constant 0 : index
    %c0_13 = arith.constant 0 : index
    %19 = vector.load %arg4[%c1, %c0_12, %c0_13] : memref<3x128x128xf32, #tpu.memory_space<vmem>>, vector<1x128x128xf32>
    %20 = vector.shape_cast %19 : vector<1x128x128xf32> to vector<128x128xf32>
    %cst_14 = arith.constant dense<0.000000e+00> : vector<16x128xf32>
    %21 = tpu.matmul %18, %20, %cst_14 {dimension_numbers = #tpu.dot_dimension_numbers<[1], [0], [0], [1], [0, 0, 1, 1], [], []>} : vector<16x128xf32>, vector<128x128xf32>, vector<16x128xf32> -> vector<16x128xf32>
    %22 = arith.addf %17, %21 : vector<16x128xf32>
    %23 = vector.extract_strided_slice %11 {offsets = [2, 0], sizes = [16, 128], strides = [1, 1]} : vector<18x128xf32> to vector<16x128xf32>
    %c2 = arith.constant 2 : index
    %c0_15 = arith.constant 0 : index
    %c0_16 = arith.constant 0 : index
    %24 = vector.load %arg4[%c2, %c0_15, %c0_16] : memref<3x128x128xf32, #tpu.memory_space<vmem>>, vector<1x128x128xf32>
    %25 = vector.shape_cast %24 : vector<1x128x128xf32> to vector<128x128xf32>
    %cst_17 = arith.constant dense<0.000000e+00> : vector<16x128xf32>
    %26 = tpu.matmul %23, %25, %cst_17 {dimension_numbers = #tpu.dot_dimension_numbers<[1], [0], [0], [1], [0, 0, 1, 1], [], []>} : vector<16x128xf32>, vector<128x128xf32>, vector<16x128xf32> -> vector<16x128xf32>
    %27 = arith.addf %22, %26 : vector<16x128xf32>
    %c0_18 = arith.constant 0 : index
    %c0_19 = arith.constant 0 : index
    %c0_20 = arith.constant 0 : index
    %28 = vector.load %arg5[%c0_18, %c0_19, %c0_20] : memref<1x16x128xf32, #tpu.memory_space<vmem>>, vector<1x16x128xf32>
    %29 = vector.shape_cast %28 : vector<1x16x128xf32> to vector<16x128xf32>
    %30 = vector.shape_cast %27 : vector<16x128xf32> to vector<1x16x128xf32>
    tpu.vector_store %arg5[%c0_18, %c0_19, %c0_20], %30 {strides = array<i32>} : memref<1x16x128xf32, #tpu.memory_space<vmem>>, vector<1x16x128xf32>,
    %cst_21 = arith.constant dense<0.000000e+00> : vector<128xf32>
    %31 = vector.multi_reduction <add>, %27, %cst_21 [0] : vector<16x128xf32> to vector<128xf32>
    %32 = vector.shape_cast %31 : vector<128xf32> to vector<1x128xf32>
    %33 = arith.mulf %27, %27 : vector<16x128xf32>
    %cst_22 = arith.constant dense<0.000000e+00> : vector<128xf32>
    %34 = vector.multi_reduction <add>, %33, %cst_22 [0] : vector<16x128xf32> to vector<128xf32>
    %35 = vector.shape_cast %34 : vector<128xf32> to vector<1x128xf32>
    %36 = tpu.concatenate %32, %35 in 0 : vector<1x128xf32>, vector<1x128xf32> -> vector<2x128xf32>
    %c0_23 = arith.constant 0 : index
    %c0_24 = arith.constant 0 : index
    %c0_25 = arith.constant 0 : index
    %37 = vector.load %arg6[%c0_23, %c0_24, %c0_25] : memref<1x2x128xf32, #tpu.memory_space<vmem>>, vector<1x2x128xf32>
    %38 = vector.shape_cast %37 : vector<1x2x128xf32> to vector<2x128xf32>
    %39 = vector.shape_cast %36 : vector<2x128xf32> to vector<1x2x128xf32>
    tpu.vector_store %arg6[%c0_23, %c0_24, %c0_25], %39 {strides = array<i32>} : memref<1x2x128xf32, #tpu.memory_space<vmem>>, vector<1x2x128xf32>,
    return
  }
  func.func @transform_0(%arg0: i32) -> (i32, i32, i32) {
    %c0_i32 = arith.constant 0 : i32
    %c0_i32_0 = arith.constant 0 : i32
    %c0_i32_1 = arith.constant 0 : i32
    return %arg0, %c0_i32, %c0_i32_0 : i32, i32, i32
  }
  func.func @transform_1(%arg0: i32) -> (i32, i32) {
    %c0_i32 = arith.constant 0 : i32
    %c0_i32_0 = arith.constant 0 : i32
    %c0_i32_1 = arith.constant 0 : i32
    return %c0_i32, %c0_i32_0 : i32, i32
  }
  func.func @transform_2(%arg0: i32) -> (i32, i32) {
    %c0_i32 = arith.constant 0 : i32
    %c0_i32_0 = arith.constant 0 : i32
    %c0_i32_1 = arith.constant 0 : i32
    return %c0_i32, %c0_i32_0 : i32, i32
  }
  func.func @transform_3(%arg0: i32) -> (i32, i32, i32) {
    %c0_i32 = arith.constant 0 : i32
    %c0_i32_0 = arith.constant 0 : i32
    %c0_i32_1 = arith.constant 0 : i32
    %c0_i32_2 = arith.constant 0 : i32
    return %c0_i32, %c0_i32_0, %c0_i32_1 : i32, i32, i32
  }
  func.func @transform_4(%arg0: i32) -> (i32, i32, i32) {
    %c0_i32 = arith.constant 0 : i32
    %c0_i32_0 = arith.constant 0 : i32
    %c0_i32_1 = arith.constant 0 : i32
    return %arg0, %c0_i32, %c0_i32_0 : i32, i32, i32
  }
  func.func @transform_5(%arg0: i32) -> (i32, i32, i32) {
    %c0_i32 = arith.constant 0 : i32
    %c0_i32_0 = arith.constant 0 : i32
    %c0_i32_1 = arith.constant 0 : i32
    return %arg0, %c0_i32, %c0_i32_0 : i32, i32, i32
  }
}

module attributes {stable_mosaic.version = 11 : i64} {
  func.func @_bn_relu_kernel(%arg0: i32, %arg1: memref<1x16x128xf32, #tpu.memory_space<vmem>>, %arg2: memref<1x128xf32, #tpu.memory_space<vmem>>, %arg3: memref<1x128xf32, #tpu.memory_space<vmem>>, %arg4: memref<1x16x128xf32, #tpu.memory_space<vmem>>) attributes {dimension_semantics = [#tpu.dimension_semantics<parallel>], iteration_bounds = array<i64: 2>, scalar_prefetch = 0 : i64, scratch_operands = 0 : i64, tpu.core_type = #tpu.core_type<tc>, window_params = [{transform_indices = @transform_0, window_bounds = array<i64: 1, 16, 128>}, {pipeline_mode = #tpu.pipeline_mode<synchronous>, transform_indices = @transform_1, window_bounds = array<i64: 1, 128>}, {pipeline_mode = #tpu.pipeline_mode<synchronous>, transform_indices = @transform_2, window_bounds = array<i64: 1, 128>}, {transform_indices = @transform_3, window_bounds = array<i64: 1, 16, 128>}]} {
    %c0 = arith.constant 0 : index
    %c0_0 = arith.constant 0 : index
    %c0_1 = arith.constant 0 : index
    %0 = vector.load %arg1[%c0, %c0_0, %c0_1] : memref<1x16x128xf32, #tpu.memory_space<vmem>>, vector<1x16x128xf32>
    %1 = vector.shape_cast %0 : vector<1x16x128xf32> to vector<16x128xf32>
    %c0_2 = arith.constant 0 : index
    %c0_3 = arith.constant 0 : index
    %2 = vector.load %arg2[%c0_2, %c0_3] : memref<1x128xf32, #tpu.memory_space<vmem>>, vector<1x128xf32>
    %3 = vector.broadcast %2 : vector<1x128xf32> to vector<16x128xf32>
    %4 = arith.mulf %1, %3 : vector<16x128xf32>
    %c0_4 = arith.constant 0 : index
    %c0_5 = arith.constant 0 : index
    %5 = vector.load %arg3[%c0_4, %c0_5] : memref<1x128xf32, #tpu.memory_space<vmem>>, vector<1x128xf32>
    %6 = vector.broadcast %5 : vector<1x128xf32> to vector<16x128xf32>
    %7 = arith.addf %4, %6 : vector<16x128xf32>
    %cst = arith.constant 0.000000e+00 : f32
    %8 = vector.broadcast %cst : f32 to vector<16x128xf32>
    %9 = arith.maximumf %7, %8 : vector<16x128xf32>
    %c0_6 = arith.constant 0 : index
    %c0_7 = arith.constant 0 : index
    %c0_8 = arith.constant 0 : index
    %10 = vector.load %arg4[%c0_6, %c0_7, %c0_8] : memref<1x16x128xf32, #tpu.memory_space<vmem>>, vector<1x16x128xf32>
    %11 = vector.shape_cast %10 : vector<1x16x128xf32> to vector<16x128xf32>
    %12 = vector.shape_cast %9 : vector<16x128xf32> to vector<1x16x128xf32>
    tpu.vector_store %arg4[%c0_6, %c0_7, %c0_8], %12 {strides = array<i32>} : memref<1x16x128xf32, #tpu.memory_space<vmem>>, vector<1x16x128xf32>,
    return
  }
  func.func @transform_0(%arg0: i32) -> (i32, i32, i32) {
    %c0_i32 = arith.constant 0 : i32
    %c0_i32_0 = arith.constant 0 : i32
    %c0_i32_1 = arith.constant 0 : i32
    return %arg0, %c0_i32, %c0_i32_0 : i32, i32, i32
  }
  func.func @transform_1(%arg0: i32) -> (i32, i32) {
    %c0_i32 = arith.constant 0 : i32
    %c0_i32_0 = arith.constant 0 : i32
    %c0_i32_1 = arith.constant 0 : i32
    return %c0_i32, %c0_i32_0 : i32, i32
  }
  func.func @transform_2(%arg0: i32) -> (i32, i32) {
    %c0_i32 = arith.constant 0 : i32
    %c0_i32_0 = arith.constant 0 : i32
    %c0_i32_1 = arith.constant 0 : i32
    return %c0_i32, %c0_i32_0 : i32, i32
  }
  func.func @transform_3(%arg0: i32) -> (i32, i32, i32) {
    %c0_i32 = arith.constant 0 : i32
    %c0_i32_0 = arith.constant 0 : i32
    %c0_i32_1 = arith.constant 0 : i32
    return %arg0, %c0_i32, %c0_i32_0 : i32, i32, i32
  }
}

</mosaic_0001>

<bundles_post_ra>
// kernel: tile.28
= control target key start
LH: loop header
LB: loop body
LE: loop exit
PB: predicated region body
PF: predicated region fallthrough
CT: control target
= control target key end

     0   :  { %s28_s0 = inlined_call_operand.vmem [shape: f32[8], index: 0, kind: input, shape index: {}]   ;;  %s29_s1 = inlined_call_operand.vmem [shape: f32[16,8], index: 1, kind: output, shape index: {}]  }
   0x1   :  { %v4_v0 = vld [vmem:[%s28_s0] ss:$0 sm:$0xff] }
   0x2   :  { %5 = vst [vmem:[%s29_s1] sm:$0xff] %v4_v0  ;;  %8 = vst [vmem:[%s29_s1 + $0x8] sm:$0xff] %v4_v0 }

// kernel: tile.29
= control target key start
LH: loop header
LB: loop body
LE: loop exit
PB: predicated region body
PF: predicated region fallthrough
CT: control target
= control target key end

     0   :  { %s133_s10 = smov 120   ;;  %s134_s11 = smov 104   ;;  %vm3_vm0 = vcmask 64512   ;;  %vm9_vm1 = vcmask 1048512   ;;  %vm15_vm2 = vcmask 982912   ;;  %vm21_vm3 = vcmask 917312   ;;  %s209_s0 = inlined_call_operand.vmem [shape: f32[16,8], index: 0, kind: input, shape index: {}]   ;;  %s210_s1 = inlined_call_operand.vmem [shape: f32[1,128], index: 1, kind: output, shape index: {}]  }
   0x1   :  { %v103_v0 = vld [vmem:[%s209_s0 + $0xf] sm:$0x1]   ;;  %v105_v1 = vld [vmem:[%s209_s0 + $0xd] sm:$0x1]   ;;  %v104_v2 = vld [vmem:[%s209_s0 + $0xe] sm:$0x1]  }
   0x2   :  { %7 = vrot.lane.b32.xlu0 %v103_v0, %s133_s10  ;;  %19 = vrot.lane.b32.xlu1 %v105_v1, %s134_s11  ;;  %v106_v3 = vld [vmem:[%s209_s0 + $0xc] sm:$0x1]   ;;  %s135_s16 = smov 112   ;;  %s136_s17 = smov 96   ;;  %v107_v4 = vld [vmem:[%s209_s0 + $0xb] sm:$0x1]  }
   0x3   :  { %v108_v5 = vld [vmem:[%s209_s0 + $0xa] sm:$0x1]   ;;  %v2_v6 = vld [vmem:[%s209_s0] sm:$0x1]   ;;  %s137_s24 = smov 88   ;;  %s138_s25 = smov 80  }
   0x4   :  { %4 = vst.msk [vmem:[#allocation0] sm:$0x1] %vm3_vm0, %v2_v6   ;;  %v109_v7 = vld [vmem:[%s209_s0 + $0x9] sm:$0x1]   ;;  %v110_v8 = vld [vmem:[%s209_s0 + $0x8] sm:$0x1]  }
   0x5   :  { %s139_s30 = smov 72   ;;  %s140_s2 = smov 64   ;;  %v111_v9 = vld [vmem:[%s209_s0 + $0x7] sm:$0x1]   ;;  %v112_v10 = vld [vmem:[%s209_s0 + $0x6] sm:$0x1]  }
   0x6   :  { %13 = vrot.lane.b32.xlu0 %v104_v2, %s135_s16  ;;  %25 = vrot.lane.b32.xlu1 %v106_v3, %s136_s17  ;;  %s141_s7 = smov 56   ;;  %s142_s8 = smov 48   ;;  %v113_v11 = vld [vmem:[%s209_s0 + $0x5] sm:$0x1]   ;;  %v114_v12 = vld [vmem:[%s209_s0 + $0x4] sm:$0x1]  }
   0x7   :  { %s143_s13 = smov 40   ;;  %s144_s14 = smov 32   ;;  %v115_v13 = vld [vmem:[%s209_s0 + $0x3] sm:$0x1]   ;;  %v116_v14 = vld [vmem:[%s209_s0 + $0x2] sm:$0x1]  }
   0x8   :  { %s145_s19 = smov 24   ;;  %s146_s20 = smov 16   ;;  %v117_v15 = vld [vmem:[%s209_s0 + $0x1] sm:$0x1]   ;;  %vm27_vm4 = vcmask 851712   ;;  %vm33_vm5 = vcmask 786112  }
   0x9   :  { %s147_s0 = smov 8   ;;  %vm39_vm6 = vcmask 720512   ;;  %vm45_vm7 = vcmask 654912   ;;  %vm51_vm8 = vcmask 589312   ;;  %vm57_vm9 = vcmask 523712  }
   0xa   :  { %31 = vrot.lane.b32.xlu0 %v107_v4, %s137_s24  ;;  %37 = vrot.lane.b32.xlu1 %v108_v5, %s138_s25  ;;  %vm63_vm10 = vcmask 458112   ;;  %vm69_vm11 = vcmask 392512   ;;  %vm75_vm12 = vcmask 326912   ;;  %vm81_vm13 = vcmask 261312  }
   0xb   :  { %vm87_vm14 = vcmask 195712   ;;  %vm93_vm15 = vcmask 130112  }
   0xe   :  { %43 = vrot.lane.b32.xlu0 %v109_v7, %s139_s30  ;;  %49 = vrot.lane.b32.xlu1 %v110_v8, %s140_s2 }
  0x12   :  { %55 = vrot.lane.b32.xlu0 %v111_v9, %s141_s7  ;;  %61 = vrot.lane.b32.xlu1 %v112_v10, %s142_s8 }
  0x16   :  { %67 = vrot.lane.b32.xlu0 %v113_v11, %s143_s13  ;;  %73 = vrot.lane.b32.xlu1 %v114_v12, %s144_s14 }
  0x1a   :  { %79 = vrot.lane.b32.xlu0 %v115_v13, %s145_s19  ;;  %85 = vrot.lane.b32.xlu1 %v116_v14, %s146_s20 }
  0x1e   :  { %91 = vrot.lane.b32.xlu0 %v117_v15, %s147_s0 }
  0x74   :  { %v8_v16 = vpop.permute.xlu0 %7   ;;  %v20_v17 = vpop.permute.xlu1 %19  }
  0x75   :  { %10 = vst.msk [vmem:[#allocation0] sm:$0x1] %vm9_vm1, %v8_v16  }
  0x78   :  { %v14_v18 = vpop.permute.xlu0 %13   ;;  %v26_v19 = vpop.permute.xlu1 %25  }
  0x79   :  { %16 = vst.msk [vmem:[#allocation0] sm:$0x1] %vm15_vm2, %v14_v18  }
  0x7a   :  { %22 = vst.msk [vmem:[#allocation0] sm:$0x1] %vm21_vm3, %v20_v17  }
  0x7b   :  { %28 = vst.msk [vmem:[#allocation0] sm:$0x1] %vm27_vm4, %v26_v19  }
  0x7c   :  { %v32_v20 = vpop.permute.xlu0 %31   ;;  %v38_v21 = vpop.permute.xlu1 %37  }
  0x7d   :  { %34 = vst.msk [vmem:[#allocation0] sm:$0x1] %vm33_vm5, %v32_v20  }
  0x7e   :  { %40 = vst.msk [vmem:[#allocation0] sm:$0x1] %vm39_vm6, %v38_v21  }
  0x80   :  { %v44_v22 = vpop.permute.xlu0 %43   ;;  %v50_v23 = vpop.permute.xlu1 %49  }
  0x81   :  { %46 = vst.msk [vmem:[#allocation0] sm:$0x1] %vm45_vm7, %v44_v22  }
  0x82   :  { %52 = vst.msk [vmem:[#allocation0] sm:$0x1] %vm51_vm8, %v50_v23  }
  0x84   :  { %v56_v24 = vpop.permute.xlu0 %55   ;;  %v62_v25 = vpop.permute.xlu1 %61  }
  0x85   :  { %58 = vst.msk [vmem:[#allocation0] sm:$0x1] %vm57_vm9, %v56_v24  }
  0x86   :  { %64 = vst.msk [vmem:[#allocation0] sm:$0x1] %vm63_vm10, %v62_v25  }
  0x88   :  { %v68_v26 = vpop.permute.xlu0 %67   ;;  %v74_v27 = vpop.permute.xlu1 %73  }
  0x89   :  { %70 = vst.msk [vmem:[#allocation0] sm:$0x1] %vm69_vm11, %v68_v26  }
  0x8a   :  { %76 = vst.msk [vmem:[#allocation0] sm:$0x1] %vm75_vm12, %v74_v27  }
  0x8c   :  { %v80_v28 = vpop.permute.xlu0 %79   ;;  %v86_v29 = vpop.permute.xlu1 %85  }
  0x8d   :  { %82 = vst.msk [vmem:[#allocation0] sm:$0x1] %vm81_vm13, %v80_v28  }
  0x8e   :  { %88 = vst.msk [vmem:[#allocation0] sm:$0x1] %vm87_vm14, %v86_v29  }
  0x90   :  { %v92_v30 = vpop.permute.xlu0 %91  }
  0x91   :  { %94 = vst.msk [vmem:[#allocation0] sm:$0x1] %vm93_vm15, %v92_v30  }
  0x98   :  { %v99_v31 = vld [vmem:[#allocation0] sm:$0x1] }
  0x99   :  { %102 = vst [vmem:[%s210_s1] sm:$0x1] %v99_v31 }

// kernel: double_conv.3
= control target key start
LH: loop header
LB: loop body
LE: loop exit
PB: predicated region body
PF: predicated region fallthrough
CT: control target
= control target key end

     0   :  { %s739_s12 = smov 0   ;;  %s853_s0 = inlined_call_operand.vmem [shape: f32[2,16,64], index: 0, kind: input, shape index: {}]   ;;  %s854_s1 = inlined_call_operand.vmem [shape: f32[3,64,128], index: 1, kind: input, shape index: {}]   ;;  %s855_s2 = inlined_call_operand.vmem [shape: f32[2,16,128], index: 2, kind: output, shape index: {0}]   ;;  %s856_s3 = inlined_call_operand.vmem [shape: f32[2,2,128], index: 3, kind: output, shape index: {1}]  }
   0x1 LB: > { %s580_s13 = sadd.s32 4294967295, %s717_s12   ;;  %p584_p0 = scmp.ge.s32.totalorder %s717_s12, 1  ;;  %s717_s12 = sphi %s739_s12, %s14_s12  }
   0x2   : > { %p140_p1 = scmp.lt.s32.totalorder %s717_s12, 3 }
   0x4   : > { %p141_p2 = pnand %p584_p0, %p140_p1 }
   0x5   : > { %p168_p3 = scmp.lt.s32.totalorder (!%p141_p2), %s580_s13, 1 }
   0x6   : > { %144 = sbr.rel (%p141_p2) target bundleno = 261 (0x105), region = 28 }
   0xb   : > { %v597_v0 = vld [vmem:[%s854_s1 + $0x78] sm:$0xff]  ;;  %v596_v2 = vld [vmem:[%s854_s1 + $0x70] sm:$0xff]  ;;  %v595_v4 = vld [vmem:[%s854_s1 + $0x68] sm:$0xff]  ;;  %s858_s13 = smov (!%p168_p3, %s580_s13), 1  ;;  %vm186_vm0 = vcmask 1040384   ;;  %vm213_vm1 = vcmask 1046528  }
   0xc   : > { %v201_v1 = vld [vmem:[%s854_s1 + $0x38] sm:$0xff]  ;;  %646 = vmatprep.subr.mxu0 %v597_v0  ;;  %v200_v3 = vld [vmem:[%s854_s1 + $0x30] sm:$0xff]  ;;  %v199_v5 = vld [vmem:[%s854_s1 + $0x28] sm:$0xff]  ;;  %s614_s30 = sshll.u32 %s858_s13, 4  ;;  %vm219_vm2 = vcmask 523264   ;;  %vm387_vm3 = vcmask 1045504  }
   0xd   : > { %665 = vmatprep.subr.mxu1 %v201_v1  ;;  %647 = vmatpush3.msra.mxu0 %v597_v0  ;;  %v594_v6 = vld [vmem:[%s854_s1 + $0x60] sm:$0xff]  ;;  %v593_v8 = vld [vmem:[%s854_s1 + $0x58] sm:$0xff]  ;;  %s172_s8 = scalar_lea.vmem %s853_s0, %s614_s30  ;;  %v592_v14 = vld [vmem:[%s854_s1 + $0x50] sm:$0xff]  ;;  %s177_s19 = scalar_lea.vmem %s855_s2, %s614_s30 }
   0xe   : > { %666 = vmatpush3.msra.mxu1 %v201_v1  ;;  %648 = vmatprep.subr.mxu0 %v596_v2  ;;  %v198_v7 = vld [vmem:[%s854_s1 + $0x20] sm:$0xff]  ;;  %v197_v9 = vld [vmem:[%s854_s1 + $0x18] sm:$0xff]  ;;  %v183_v11 = vld [vmem:[%s172_s8 + $0x8] sm:$0xff]  ;;  %s589_s30 = sshll.u32 %s858_s13, 1 }
   0xf   : > { %667 = vmatprep.subr.mxu1 %v200_v3  ;;  %649 = vmatpush3.msra.mxu0 %v596_v2  ;;  %v182_v10 = vld [vmem:[%s172_s8] sm:$0xff]  ;;  %v188_v13 = vrot.slane %v183_v11, 7  ;;  %v196_v15 = vld [vmem:[%s854_s1 + $0x10] sm:$0xff]  ;;  %v591_v19 = vld [vmem:[%s854_s1 + $0x48] sm:$0xff]  ;;  %s181_s22 = scalar_lea.vmem %s856_s3, %s589_s30 }
  0x10   : > { %668 = vmatpush3.msra.mxu1 %v200_v3  ;;  %650 = vmatprep.subr.mxu0 %v595_v4  ;;  %v187_v12 = vrot.slane %v182_v10, 7  ;;  %v195_v20 = vld [vmem:[%s854_s1 + $0x8] sm:$0xff]  ;;  %v590_v24 = vld [vmem:[%s854_s1 + $0x40] sm:$0xff]  ;;  %v609_v30 = vld [vmem:[%s854_s1 + $0xb8] sm:$0xff] }
  0x11   : > { %669 = vmatprep.subr.mxu1 %v199_v5  ;;  %651 = vmatpush3.msra.mxu0 %v595_v4  ;;  %v193_v18 = vsel %vm186_vm0, %v188_v13, 0.0  ;;  %v194_v25 = vld [vmem:[%s854_s1] sm:$0xff]  ;;  %v608_v32 = vld [vmem:[%s854_s1 + $0xb0] sm:$0xff]  ;;  %v607_v33 = vld [vmem:[%s854_s1 + $0xa8] sm:$0xff] }
  0x12   : > { %670 = vmatpush3.msra.mxu1 %v199_v5  ;;  %652 = vmatprep.subr.mxu0 %v594_v6  ;;  %v189_v16 = vsel %vm186_vm0, %v187_v12, %v188_v13  ;;  %v192_v17 = vsel %vm186_vm0, 0.0, %v187_v12  ;;  %v217_v23 = vrot.slane %v193_v18, 1  ;;  %v606_v34 = vld [vmem:[%s854_s1 + $0xa0] sm:$0xff]  ;;  %v605_v35 = vld [vmem:[%s854_s1 + $0x98] sm:$0xff]  ;;  %v604_v36 = vld [vmem:[%s854_s1 + $0x90] sm:$0xff]  ;;  %v391_v37 = vrot.slane %v193_v18, 2 }
  0x13   : > { %671 = vmatprep.subr.mxu1 %v198_v7  ;;  %653 = vmatpush3.msra.mxu0 %v594_v6  ;;  %v214_v21 = vrot.slane %v192_v17, 1  ;;  %v215_v22 = vrot.slane %v189_v16, 1  ;;  %v388_v26 = vrot.slane %v192_v17, 2  ;;  %v389_v27 = vrot.slane %v189_v16, 2  ;;  %v603_v38 = vld [vmem:[%s854_s1 + $0x88] sm:$0xff]  ;;  %v602_v39 = vld [vmem:[%s854_s1 + $0x80] sm:$0xff] }
  0x14   : > { %672 = vmatpush3.msra.mxu1 %v198_v7  ;;  %654 = vmatprep.subr.mxu0 %v593_v8 }
  0x15   : > { %673 = vmatprep.subr.mxu1 %v197_v9  ;;  %655 = vmatpush3.msra.mxu0 %v593_v8  ;;  %v216_v28 = vsel %vm213_vm1, %v214_v21, %v215_v22  ;;  %v218_v29 = vsel %vm213_vm1, %v215_v22, %v217_v23  ;;  %v390_v31 = vsel %vm387_vm3, %v388_v26, %v389_v27 }
  0x16   : > { %674 = vmatpush3.msra.mxu1 %v197_v9  ;;  %656 = vmatprep.subr.mxu0 %v592_v14  ;;  %v392_v40 = vsel %vm387_vm3, %v389_v27, %v391_v37 }
  0x17   : > { %675 = vmatprep.subr.mxu1 %v196_v15  ;;  %657 = vmatpush3.msra.mxu0 %v592_v14 }
  0x18   : > { %676 = vmatpush3.msra.mxu1 %v196_v15  ;;  %658 = vmatprep.subr.mxu0 %v591_v19 }
  0x19   : > { %677 = vmatprep.subr.mxu1 %v195_v20  ;;  %659 = vmatpush3.msra.mxu0 %v591_v19 }
  0x1a   : > { %678 = vmatpush3.msra.mxu1 %v195_v20  ;;  %660 = vmatprep.subr.mxu0 %v590_v24 }
  0x1b   : > { %679 = vmatprep.subr.mxu1 %v194_v25  ;;  %661 = vmatpush3.msra.mxu0 %v590_v24 }
  0x1c   : > { %662 = vmatprep.mubr.msk.f32.mxu0 %vm219_vm2, %v216_v28  ;;  %680 = vmatpush3.msra.mxu1 %v194_v25 }
  0x1d   : > { %681 = vmatprep.mubr.msk.f32.mxu1 %vm219_vm2, %v192_v17  ;;  %663 = vmatmul.mubr.msk.f32.vlgmr.msra.gmra.mxu0 %vm219_vm2, %v218_v29 }
  0x1e   : > { %682 = vmatmul.mubr.msk.f32.vlgmr.msra.gmra.mxu1 %vm219_vm2, %v189_v16  ;;  %684 = vmatprep.subr.mxu0 %v609_v30 }
  0x1f   : > { %700 = vmatprep.mubr.msk.f32.mxu0 %vm219_vm2, %v390_v31  ;;  %685 = vmatpush3.msra.mxu0 %v609_v30 }
  0x20   : > { %686 = vmatprep.subr.mxu0 %v608_v32 }
  0x21   : > { %687 = vmatpush3.msra.mxu0 %v608_v32 }
  0x22   : > { %688 = vmatprep.subr.mxu0 %v607_v33 }
  0x23   : > { %689 = vmatpush3.msra.mxu0 %v607_v33 }
  0x24   : > { %690 = vmatprep.subr.mxu0 %v606_v34 }
  0x25   : > { %691 = vmatpush3.msra.mxu0 %v606_v34 }
  0x26   : > { %692 = vmatprep.subr.mxu0 %v605_v35 }
  0x27   : > { %693 = vmatpush3.msra.mxu0 %v605_v35 }
  0x28   : > { %694 = vmatprep.subr.mxu0 %v604_v36 }
  0x29   : > { %695 = vmatpush3.msra.mxu0 %v604_v36 }
  0x2a   : > { %696 = vmatprep.subr.mxu0 %v603_v38 }
  0x2b   : > { %697 = vmatpush3.msra.mxu0 %v603_v38 }
  0x2c   : > { %698 = vmatprep.subr.mxu0 %v602_v39 }
  0x2d   : > { %699 = vmatpush3.msra.mxu0 %v602_v39 }
  0x2e   : > { %701 = vmatmul.mubr.msk.f32.vlgmr.msra.gmra.mxu0 %vm219_vm2, %v392_v40 }
  0xdd   : > { %v664_v41 = vpop.f32.mrf.mxu0 }
  0xde   : > { %v683_v42 = vpop.f32.mrf.mxu1 }
  0xdf   : > { %v290_v43 = vpop.f32.mrf.mxu0  ;;  %v375_v45 = vadd.f32 %v683_v42, %v664_v41 }
  0xe0   : > { %v369_v44 = vpop.f32.mrf.mxu1 }
  0xe1   : > { %v370_v47 = vadd.f32 %v369_v44, %v290_v43 }
  0xee   : > { %v702_v46 = vpop.f32.mrf.mxu0 }
  0xef   : > { %v473_v48 = vadd.f32 %v702_v46, %v375_v45 }
  0xf0   : > { %v463_v49 = vpop.f32.mrf.mxu0 }
  0xf1   : > { %475 = vst [vmem:[%s177_s19 + $0x8] sm:$0xff] %v473_v48  ;;  %v472_v50 = vadd.f32 %v463_v49, %v370_v47  ;;  %v484_v51 = vmul.f32 %v473_v48, %v473_v48 }
  0xf3   : > { %474 = vst [vmem:[%s177_s19] sm:$0xff] %v472_v50  ;;  %v476_v52 = vadd.f32 %v473_v48, %v472_v50  ;;  %v483_v53 = vmul.f32 %v472_v50, %v472_v50 }
  0xf5   : > { %v477_v54 = vrot.slane %v476_v52, 4  ;;  %v485_v55 = vadd.f32 %v484_v51, %v483_v53 }
  0xf7   : > { %v478_v56 = vadd.f32 %v477_v54, %v476_v52  ;;  %v486_v57 = vrot.slane %v485_v55, 4 }
  0xf9   : > { %v479_v58 = vrot.slane %v478_v56, 2  ;;  %v487_v59 = vadd.f32 %v486_v57, %v485_v55 }
  0xfb   : > { %v480_v60 = vadd.f32 %v479_v58, %v478_v56  ;;  %v488_v61 = vrot.slane %v487_v59, 2 }
  0xfd   : > { %v481_v62 = vrot.slane %v480_v60, 1  ;;  %v489_v63 = vadd.f32 %v488_v61, %v487_v59 }
  0xff   : > { %v490_v0 = vrot.slane %v489_v63, 1  ;;  %v482_v1 = vadd.f32 %v481_v62, %v480_v60 }
 0x101   : > { %v491_v2 = vadd.f32 %v490_v0, %v489_v63 }
 0x103   : > { %v492_v3 = vsel %vm186_vm0, %v482_v1, %v491_v2 }
 0x104   : > { %493 = vst [vmem:[%s181_s22] sm:$0x3] %v492_v3 }
 0x105 PF: > { %s14_s12 = sadd.s32 1, %s717_s12  }
 0x106   : > { %p11_p4 = scmp.ge.s32.totalorder %s14_s12, 4  }
 0x108   :  { %13 = sbr.rel (!%p11_p4) target bundleno = 1 (0x1), region = 72 }

// kernel: double_conv.4
= control target key start
LH: loop header
LB: loop body
LE: loop exit
PB: predicated region body
PF: predicated region fallthrough
CT: control target
= control target key end

     0   :  { %s925_s18 = smov 0   ;;  %s1125_s0 = inlined_call_operand.vmem [shape: f32[2,16,128], index: 0, kind: input, shape index: {}]   ;;  %s1126_s1 = inlined_call_operand.vmem [shape: f32[1,128], index: 1, kind: input, shape index: {}]   ;;  %s1127_s2 = inlined_call_operand.vmem [shape: f32[1,128], index: 2, kind: input, shape index: {}]   ;;  %s1128_s3 = inlined_call_operand.vmem [shape: f32[3,128,128], index: 3, kind: input, shape index: {}]   ;;  %s1129_s4 = inlined_call_operand.vmem [shape: f32[2,16,128], index: 4, kind: output, shape index: {0}]   ;;  %s1130_s5 = inlined_call_operand.vmem [shape: f32[2,2,128], index: 5, kind: output, shape index: {1}]  }
   0x1 LB: > { %s670_s19 = sadd.s32 4294967295, %s893_s18   ;;  %p674_p0 = scmp.ge.s32.totalorder %s893_s18, 1  ;;  %s893_s18 = sphi %s925_s18, %s16_s18  }
   0x2   : > { %p190_p1 = scmp.lt.s32.totalorder %s893_s18, 3 }
   0x4   : > { %p191_p2 = pnand %p674_p0, %p190_p1 }
   0x5   : > { %p222_p3 = scmp.lt.s32.totalorder (!%p191_p2), %s670_s19, 1 }
   0x6   : > { %194 = sbr.rel (%p191_p2) target bundleno = 293 (0x125), region = 36 }
   0xb   : > { %v697_v0 = vld [vmem:[%s1128_s3 + $0xf8] sm:$0xff]  ;;  %v696_v2 = vld [vmem:[%s1128_s3 + $0xf0] sm:$0xff]  ;;  %v695_v4 = vld [vmem:[%s1128_s3 + $0xe8] sm:$0xff]  ;;  %s1132_s19 = smov (!%p222_p3, %s670_s19), 1  ;;  %vm260_vm0 = vcmask 1040384   ;;  %vm304_vm1 = vcmask 1046528  }
   0xc   : > { %v284_v1 = vld [vmem:[%s1128_s3 + $0x78] sm:$0xff]  ;;  %774 = vmatprep.subr.mxu0 %v697_v0  ;;  %v283_v3 = vld [vmem:[%s1128_s3 + $0x70] sm:$0xff]  ;;  %v282_v5 = vld [vmem:[%s1128_s3 + $0x68] sm:$0xff]  ;;  %s718_s11 = sshll.u32 %s1132_s19, 4  ;;  %vm479_vm2 = vcmask 1045504  }
   0xd   : > { %809 = vmatprep.subr.mxu1 %v284_v1  ;;  %775 = vmatpush3.msra.mxu0 %v697_v0  ;;  %v694_v6 = vld [vmem:[%s1128_s3 + $0xe0] sm:$0xff]  ;;  %v693_v8 = vld [vmem:[%s1128_s3 + $0xd8] sm:$0xff]  ;;  %s226_s20 = scalar_lea.vmem %s1125_s0, %s718_s11  ;;  %v692_v10 = vld [vmem:[%s1128_s3 + $0xd0] sm:$0xff]  ;;  %s231_s13 = scalar_lea.vmem %s1129_s4, %s718_s11 }
   0xe   : > { %810 = vmatpush3.msra.mxu1 %v284_v1  ;;  %776 = vmatprep.subr.mxu0 %v696_v2  ;;  %v281_v7 = vld [vmem:[%s1128_s3 + $0x60] sm:$0xff]  ;;  %v280_v9 = vld [vmem:[%s1128_s3 + $0x58] sm:$0xff]  ;;  %v279_v11 = vld [vmem:[%s1128_s3 + $0x50] sm:$0xff]  ;;  %s679_s11 = sshll.u32 %s1132_s19, 1 }
   0xf   : > { %811 = vmatprep.subr.mxu1 %v283_v3  ;;  %777 = vmatpush3.msra.mxu0 %v696_v2  ;;  %v691_v12 = vld [vmem:[%s1128_s3 + $0xc8] sm:$0xff]  ;;  %v236_v14 = vld [vmem:[%s226_s20] sm:$0xff]  ;;  %v689_v22 = vld [vmem:[%s1128_s3 + $0xb8] sm:$0xff]  ;;  %s235_s16 = scalar_lea.vmem %s1130_s5, %s679_s11 }
  0x10   : > { %812 = vmatpush3.msra.mxu1 %v283_v3  ;;  %778 = vmatprep.subr.mxu0 %v695_v4  ;;  %v278_v13 = vld [vmem:[%s1128_s3 + $0x48] sm:$0xff]  ;;  %v680_v16 = vld [vmem:[%s1126_s1] ss:$0 sm:$0xff]  ;;  %v276_v23 = vld [vmem:[%s1128_s3 + $0x38] sm:$0xff] }
  0x11   : > { %813 = vmatprep.subr.mxu1 %v282_v5  ;;  %779 = vmatpush3.msra.mxu0 %v695_v4  ;;  %v237_v15 = vld [vmem:[%s226_s20 + $0x8] sm:$0xff]  ;;  %v681_v17 = vld [vmem:[%s1127_s2] ss:$0 sm:$0xff]  ;;  %v245_v20 = vmul.f32 %v680_v16, %v236_v14  ;;  %v688_v26 = vld [vmem:[%s1128_s3 + $0xb0] sm:$0xff] }
  0x12   : > { %814 = vmatpush3.msra.mxu1 %v282_v5  ;;  %780 = vmatprep.subr.mxu0 %v694_v6  ;;  %v690_v18 = vld [vmem:[%s1128_s3 + $0xc0] sm:$0xff]  ;;  %v246_v21 = vmul.f32 %v680_v16, %v237_v15  ;;  %v275_v27 = vld [vmem:[%s1128_s3 + $0x30] sm:$0xff]  ;;  %v687_v30 = vld [vmem:[%s1128_s3 + $0xa8] sm:$0xff] }
  0x13   : > { %815 = vmatprep.subr.mxu1 %v281_v7  ;;  %781 = vmatpush3.msra.mxu0 %v694_v6  ;;  %v277_v19 = vld [vmem:[%s1128_s3 + $0x40] sm:$0xff]  ;;  %v254_v24 = vadd.f32 %v681_v17, %v245_v20  ;;  %v274_v31 = vld [vmem:[%s1128_s3 + $0x28] sm:$0xff]  ;;  %v685_v36 = vld [vmem:[%s1128_s3 + $0x98] sm:$0xff] }
  0x14   : > { %816 = vmatpush3.msra.mxu1 %v281_v7  ;;  %782 = vmatprep.subr.mxu0 %v693_v8  ;;  %v255_v25 = vadd.f32 %v681_v17, %v246_v21  ;;  %v686_v34 = vld [vmem:[%s1128_s3 + $0xa0] sm:$0xff]  ;;  %v272_v37 = vld [vmem:[%s1128_s3 + $0x18] sm:$0xff]  ;;  %v684_v40 = vld [vmem:[%s1128_s3 + $0x90] sm:$0xff] }
  0x15   : > { %817 = vmatprep.subr.mxu1 %v280_v9  ;;  %783 = vmatpush3.msra.mxu0 %v693_v8  ;;  %v256_v28 = vmax.f32 %v254_v24, 0.0  ;;  %v273_v35 = vld [vmem:[%s1128_s3 + $0x20] sm:$0xff]  ;;  %v271_v41 = vld [vmem:[%s1128_s3 + $0x10] sm:$0xff]  ;;  %v683_v45 = vld [vmem:[%s1128_s3 + $0x88] sm:$0xff] }
  0x16   : > { %818 = vmatpush3.msra.mxu1 %v280_v9  ;;  %784 = vmatprep.subr.mxu0 %v692_v10  ;;  %v257_v29 = vmax.f32 %v255_v25, 0.0  ;;  %v270_v46 = vld [vmem:[%s1128_s3 + $0x8] sm:$0xff]  ;;  %v682_v48 = vld [vmem:[%s1128_s3 + $0x80] sm:$0xff]  ;;  %vm698_vm3 = vmneg %vm260_vm0 }
  0x17   : > { %819 = vmatprep.subr.mxu1 %v279_v11  ;;  %785 = vmatpush3.msra.mxu0 %v692_v10  ;;  %v261_v32 = vrot.slane %v256_v28, 7  ;;  %v269_v49 = vld [vmem:[%s1128_s3] sm:$0xff]  ;;  %v715_v54 = vld [vmem:[%s1128_s3 + $0x178] sm:$0xff]  ;;  %v714_v56 = vld [vmem:[%s1128_s3 + $0x170] sm:$0xff] }
  0x18   : > { %820 = vmatpush3.msra.mxu1 %v279_v11  ;;  %786 = vmatprep.subr.mxu0 %v691_v12  ;;  %v262_v33 = vrot.slane %v257_v29, 7  ;;  %v713_v57 = vld [vmem:[%s1128_s3 + $0x168] sm:$0xff]  ;;  %v712_v58 = vld [vmem:[%s1128_s3 + $0x160] sm:$0xff]  ;;  %v711_v59 = vld [vmem:[%s1128_s3 + $0x158] sm:$0xff] }
  0x19   : > { %821 = vmatprep.subr.mxu1 %v278_v13  ;;  %787 = vmatpush3.msra.mxu0 %v691_v12  ;;  %v267_v39 = vsel %vm260_vm0, 0.0, %v261_v32  ;;  %v710_v60 = vld [vmem:[%s1128_s3 + $0x150] sm:$0xff]  ;;  %v709_v61 = vld [vmem:[%s1128_s3 + $0x148] sm:$0xff]  ;;  %v708_v62 = vld [vmem:[%s1128_s3 + $0x140] sm:$0xff] }
  0x1a   : > { %822 = vmatpush3.msra.mxu1 %v278_v13  ;;  %788 = vmatprep.subr.mxu0 %v690_v18  ;;  %v1026_v38 = vsel %vm260_vm0, %v261_v32, %v262_v33  ;;  %v1036_v42 = vsel %vm260_vm0, %v262_v33, 0.0  ;;  %v305_v43 = vrot.slane %v267_v39, 1  ;;  %v480_v50 = vrot.slane %v267_v39, 2  ;;  %v707_v63 = vld [vmem:[%s1128_s3 + $0x138] sm:$0xff]  ;;  %v706_v0 = vld [vmem:[%s1128_s3 + $0x130] sm:$0xff]  ;;  %v705_v1 = vld [vmem:[%s1128_s3 + $0x128] sm:$0xff] }
  0x1b   : > { %823 = vmatprep.subr.mxu1 %v277_v19  ;;  %789 = vmatpush3.msra.mxu0 %v690_v18  ;;  %v306_v44 = vrot.slane %v1026_v38, 1  ;;  %v308_v47 = vrot.slane %v1036_v42, 1  ;;  %v481_v51 = vrot.slane %v1026_v38, 2  ;;  %v704_v2 = vld [vmem:[%s1128_s3 + $0x120] sm:$0xff]  ;;  %v703_v3 = vld [vmem:[%s1128_s3 + $0x118] sm:$0xff]  ;;  %v702_v4 = vld [vmem:[%s1128_s3 + $0x110] sm:$0xff] }
  0x1c   : > { %824 = vmatpush3.msra.mxu1 %v277_v19  ;;  %790 = vmatprep.subr.mxu0 %v689_v22  ;;  %v701_v5 = vld [vmem:[%s1128_s3 + $0x108] sm:$0xff]  ;;  %v483_v6 = vrot.slane %v1036_v42, 2  ;;  %v700_v7 = vld [vmem:[%s1128_s3 + $0x100] sm:$0xff] }
  0x1d   : > { %825 = vmatprep.subr.mxu1 %v276_v23  ;;  %791 = vmatpush3.msra.mxu0 %v689_v22  ;;  %v307_v52 = vsel %vm304_vm1, %v305_v43, %v306_v44  ;;  %v309_v53 = vsel %vm304_vm1, %v306_v44, %v308_v47  ;;  %v482_v55 = vsel %vm479_vm2, %v480_v50, %v481_v51 }
  0x1e   : > { %826 = vmatpush3.msra.mxu1 %v276_v23  ;;  %792 = vmatprep.subr.mxu0 %v688_v26  ;;  %v484_v8 = vsel %vm479_vm2, %v481_v51, %v483_v6 }
  0x1f   : > { %827 = vmatprep.subr.mxu1 %v275_v27  ;;  %793 = vmatpush3.msra.mxu0 %v688_v26 }
  0x20   : > { %828 = vmatpush3.msra.mxu1 %v275_v27  ;;  %794 = vmatprep.subr.mxu0 %v687_v30 }
  0x21   : > { %829 = vmatprep.subr.mxu1 %v274_v31  ;;  %795 = vmatpush3.msra.mxu0 %v687_v30 }
  0x22   : > { %830 = vmatpush3.msra.mxu1 %v274_v31  ;;  %796 = vmatprep.subr.mxu0 %v686_v34 }
  0x23   : > { %831 = vmatprep.subr.mxu1 %v273_v35  ;;  %797 = vmatpush3.msra.mxu0 %v686_v34 }
  0x24   : > { %832 = vmatpush3.msra.mxu1 %v273_v35  ;;  %798 = vmatprep.subr.mxu0 %v685_v36 }
  0x25   : > { %833 = vmatprep.subr.mxu1 %v272_v37  ;;  %799 = vmatpush3.msra.mxu0 %v685_v36 }
  0x26   : > { %834 = vmatpush3.msra.mxu1 %v272_v37  ;;  %800 = vmatprep.subr.mxu0 %v684_v40 }
  0x27   : > { %835 = vmatprep.subr.mxu1 %v271_v41  ;;  %801 = vmatpush3.msra.mxu0 %v684_v40 }
  0x28   : > { %836 = vmatpush3.msra.mxu1 %v271_v41  ;;  %802 = vmatprep.subr.mxu0 %v683_v45 }
  0x29   : > { %837 = vmatprep.subr.mxu1 %v270_v46  ;;  %803 = vmatpush3.msra.mxu0 %v683_v45 }
  0x2a   : > { %838 = vmatpush3.msra.mxu1 %v270_v46  ;;  %804 = vmatprep.subr.mxu0 %v682_v48 }
  0x2b   : > { %839 = vmatprep.subr.mxu1 %v269_v49  ;;  %805 = vmatpush3.msra.mxu0 %v682_v48 }
  0x2c   : > { %806 = vmatprep.mubr.f32.mxu0 %v307_v52  ;;  %840 = vmatpush3.msra.mxu1 %v269_v49 }
  0x2d   : > { %841 = vmatprep.mubr.msk.f32.mxu1 %vm698_vm3, %v261_v32  ;;  %807 = vmatmul.mubr.f32.vlgmr.msra.gmra.mxu0 %v309_v53 }
  0x2e   : > { %842 = vmatmul.mubr.f32.vlgmr.msra.gmra.mxu1 %v1026_v38  ;;  %844 = vmatprep.subr.mxu0 %v715_v54 }
  0x2f   : > { %876 = vmatprep.mubr.f32.mxu0 %v482_v55  ;;  %845 = vmatpush3.msra.mxu0 %v715_v54 }
  0x30   : > { %846 = vmatprep.subr.mxu0 %v714_v56 }
  0x31   : > { %847 = vmatpush3.msra.mxu0 %v714_v56 }
  0x32   : > { %848 = vmatprep.subr.mxu0 %v713_v57 }
  0x33   : > { %849 = vmatpush3.msra.mxu0 %v713_v57 }
  0x34   : > { %850 = vmatprep.subr.mxu0 %v712_v58 }
  0x35   : > { %851 = vmatpush3.msra.mxu0 %v712_v58 }
  0x36   : > { %852 = vmatprep.subr.mxu0 %v711_v59 }
  0x37   : > { %853 = vmatpush3.msra.mxu0 %v711_v59 }
  0x38   : > { %854 = vmatprep.subr.mxu0 %v710_v60 }
  0x39   : > { %855 = vmatpush3.msra.mxu0 %v710_v60 }
  0x3a   : > { %856 = vmatprep.subr.mxu0 %v709_v61 }
  0x3b   : > { %857 = vmatpush3.msra.mxu0 %v709_v61 }
  0x3c   : > { %858 = vmatprep.subr.mxu0 %v708_v62 }
  0x3d   : > { %859 = vmatpush3.msra.mxu0 %v708_v62 }
  0x3e   : > { %860 = vmatprep.subr.mxu0 %v707_v63 }
  0x3f   : > { %861 = vmatpush3.msra.mxu0 %v707_v63 }
  0x40   : > { %862 = vmatprep.subr.mxu0 %v706_v0 }
  0x41   : > { %863 = vmatpush3.msra.mxu0 %v706_v0 }
  0x42   : > { %864 = vmatprep.subr.mxu0 %v705_v1 }
  0x43   : > { %865 = vmatpush3.msra.mxu0 %v705_v1 }
  0x44   : > { %866 = vmatprep.subr.mxu0 %v704_v2 }
  0x45   : > { %867 = vmatpush3.msra.mxu0 %v704_v2 }
  0x46   : > { %868 = vmatprep.subr.mxu0 %v703_v3 }
  0x47   : > { %869 = vmatpush3.msra.mxu0 %v703_v3 }
  0x48   : > { %870 = vmatprep.subr.mxu0 %v702_v4 }
  0x49   : > { %871 = vmatpush3.msra.mxu0 %v702_v4 }
  0x4a   : > { %872 = vmatprep.subr.mxu0 %v701_v5 }
  0x4b   : > { %873 = vmatpush3.msra.mxu0 %v701_v5 }
  0x4c   : > { %874 = vmatprep.subr.mxu0 %v700_v7 }
  0x4d   : > { %875 = vmatpush3.msra.mxu0 %v700_v7 }
  0x4e   : > { %877 = vmatmul.mubr.f32.vlgmr.msra.gmra.mxu0 %v484_v8 }
  0xed   : > { %v808_v9 = vpop.f32.mrf.mxu0 }
  0xee   : > { %v843_v10 = vpop.f32.mrf.mxu1 }
  0xef   : > { %v378_v11 = vpop.f32.mrf.mxu0  ;;  %v459_v13 = vadd.f32 %v843_v10, %v808_v9 }
  0xf0   : > { %v453_v12 = vpop.f32.mrf.mxu1 }
  0xf1   : > { %v454_v15 = vadd.f32 %v453_v12, %v378_v11 }
 0x10e   : > { %v878_v14 = vpop.f32.mrf.mxu0 }
 0x10f   : > { %v563_v16 = vadd.f32 %v878_v14, %v459_v13 }
 0x110   : > { %v553_v17 = vpop.f32.mrf.mxu0 }
 0x111   : > { %565 = vst [vmem:[%s231_s13 + $0x8] sm:$0xff] %v563_v16  ;;  %v562_v18 = vadd.f32 %v553_v17, %v454_v15  ;;  %v574_v19 = vmul.f32 %v563_v16, %v563_v16 }
 0x113   : > { %564 = vst [vmem:[%s231_s13] sm:$0xff] %v562_v18  ;;  %v566_v20 = vadd.f32 %v563_v16, %v562_v18  ;;  %v573_v21 = vmul.f32 %v562_v18, %v562_v18 }
 0x115   : > { %v567_v22 = vrot.slane %v566_v20, 4  ;;  %v575_v23 = vadd.f32 %v574_v19, %v573_v21 }
 0x117   : > { %v568_v24 = vadd.f32 %v567_v22, %v566_v20  ;;  %v576_v25 = vrot.slane %v575_v23, 4 }
 0x119   : > { %v569_v26 = vrot.slane %v568_v24, 2  ;;  %v577_v27 = vadd.f32 %v576_v25, %v575_v23 }
 0x11b   : > { %v570_v28 = vadd.f32 %v569_v26, %v568_v24  ;;  %v578_v29 = vrot.slane %v577_v27, 2 }
 0x11d   : > { %v571_v30 = vrot.slane %v570_v28, 1  ;;  %v579_v31 = vadd.f32 %v578_v29, %v577_v27 }
 0x11f   : > { %v580_v32 = vrot.slane %v579_v31, 1  ;;  %v572_v33 = vadd.f32 %v571_v30, %v570_v28 }
 0x121   : > { %v581_v34 = vadd.f32 %v580_v32, %v579_v31 }
 0x123   : > { %v582_v35 = vsel %vm260_vm0, %v572_v33, %v581_v34 }
 0x124   : > { %583 = vst [vmem:[%s235_s16] sm:$0x3] %v582_v35 }
 0x125 PF: > { %s16_s18 = sadd.s32 1, %s893_s18  }
 0x126   : > { %p13_p4 = scmp.ge.s32.totalorder %s16_s18, 4  }
 0x128   :  { %15 = sbr.rel (!%p13_p4) target bundleno = 1 (0x1), region = 80 }

// kernel: double_conv.5
= control target key start
LH: loop header
LB: loop body
LE: loop exit
PB: predicated region body
PF: predicated region fallthrough
CT: control target
= control target key end

     0   :  { %s301_s12 = smov 0   ;;  %s318_s0 = inlined_call_operand.vmem [shape: f32[2,16,128], index: 0, kind: input, shape index: {}]   ;;  %s319_s1 = inlined_call_operand.vmem [shape: f32[1,128], index: 1, kind: input, shape index: {}]   ;;  %s320_s2 = inlined_call_operand.vmem [shape: f32[1,128], index: 2, kind: input, shape index: {}]   ;;  %s321_s3 = inlined_call_operand.vmem [shape: f32[2,16,128], index: 3, kind: output, shape index: {}]  }
   0x1 LB: > { %s250_s13 = sadd.s32 4294967295, %s279_s12   ;;  %p254_p0 = scmp.ge.s32.totalorder %s279_s12, 1  ;;  %s279_s12 = sphi %s301_s12, %s13_s12  }
   0x2   : > { %p137_p1 = scmp.lt.s32.totalorder %s279_s12, 3 }
   0x4   : > { %p138_p2 = pnand %p254_p0, %p137_p1 }
   0x5   : > { %p161_p3 = scmp.lt.s32.totalorder (!%p138_p2), %s250_s13, 1 }
   0x6   : > { %141 = sbr.rel (%p138_p2) target bundleno = 22 (0x16), region = 32 }
   0xb   : > { %s323_s13 = smov (!%p161_p3, %s250_s13), 1  ;;  %v259_v0 = vld [vmem:[%s319_s1] ss:$0 sm:$0xff] }
   0xc   : > { %s263_s14 = sshll.u32 %s323_s13, 4  ;;  %v260_v3 = vld [vmem:[%s320_s2] ss:$0 sm:$0xff] }
   0xd   : > { %s165_s19 = scalar_lea.vmem %s318_s0, %s263_s14  ;;  %s170_s24 = scalar_lea.vmem %s321_s3, %s263_s14 }
   0xe   : > { %v171_v1 = vld [vmem:[%s165_s19] sm:$0xff]  ;;  %v172_v2 = vld [vmem:[%s165_s19 + $0x8] sm:$0xff] }
   0xf   : > { %v180_v4 = vmul.f32 %v259_v0, %v171_v1  ;;  %v181_v5 = vmul.f32 %v259_v0, %v172_v2 }
  0x11   : > { %v189_v6 = vadd.f32 %v260_v3, %v180_v4  ;;  %v190_v7 = vadd.f32 %v260_v3, %v181_v5 }
  0x13   : > { %v191_v8 = vmax.f32 %v189_v6, 0.0  ;;  %v192_v9 = vmax.f32 %v190_v7, 0.0 }
  0x15   : > { %193 = vst [vmem:[%s170_s24] sm:$0xff] %v191_v8  ;;  %194 = vst [vmem:[%s170_s24 + $0x8] sm:$0xff] %v192_v9 }
  0x16 PF: > { %s13_s12 = sadd.s32 1, %s279_s12  }
  0x17   : > { %p10_p4 = scmp.ge.s32.totalorder %s13_s12, 4  }
  0x19   :  { %12 = sbr.rel (!%p10_p4) target bundleno = 1 (0x1), region = 62 }

</bundles_post_ra>
